<compile_context>
chip_gen: v6e
topology: v6e:2x2x1
jax: 0.10.0
libtpu: 0.0.40
codegen_flags: <defaults>
</compile_context>

<pallas_src>
import functools

import jax
import jax.numpy as jnp
from jax import lax
from jax.experimental import pallas as pl
from jax.experimental.pallas import tpu as pltpu

MASK_TOKEN_ID = 3   # stand-in for SpecialToken['MASK']
LEN_MASK = 2        # hard-coded len_mask in the PyTorch forward
TOPK = 5            # torch.randperm(5) -> candidates are the top-5 positions


def _mask_kernel(x_ref, pos_ref, mx_ref, tp_ref, *, mask_token_id, max_pred):
    """One (tb, S) batch tile: masking + branch-free token gather.

    Invariant: pos[:, 0] != pos[:, 1] (distinct ranks of the top-5 map to
    distinct positions), which makes the masked-lane-sum gather exact.
    """
    x = x_ref[...]                       # (tb, S)  int32 token ids
    pos = pos_ref[...]                   # (tb, 2)  int32 masked positions

    tb, S = x.shape
    col = lax.broadcasted_iota(jnp.int32, (tb, S), 1)
    pos0 = pos[:, 0:1]                   # (tb, 1)
    pos1 = pos[:, 1:2]                   # (tb, 1)
    hit0 = col == pos0
    hit1 = col == pos1

    # mask_x: replace the two chosen positions with the MASK token id.
    mx_ref[...] = jnp.where(hit0 | hit1, jnp.int32(mask_token_id), x)

    # Branch-free gather of the original tokens at the masked positions
    # (exact because pos0 != pos1 -> each masked sum has exactly one hit).
    tok0 = jnp.sum(jnp.where(hit0, x, jnp.int32(0)), axis=1, keepdims=True)
    tok1 = jnp.sum(jnp.where(hit1, x, jnp.int32(0)), axis=1, keepdims=True)

    # Merged side output: columns [0, max_pred) = tokens, [max_pred, 2*max_pred)
    # = positions, zero-padded past LEN_MASK (matches the torch.cat(..., zeros) pad).
    pcol = lax.broadcasted_iota(jnp.int32, (tb, 2 * max_pred), 1)
    zero = jnp.int32(0)
    tp_ref[...] = jnp.where(
        pcol == 0, tok0,
        jnp.where(pcol == 1, tok1,
                  jnp.where(pcol == max_pred, pos0,
                            jnp.where(pcol == max_pred + 1, pos1, zero))))


def _pick_batch_tile(B, S):
    """Largest (8,128)-legal batch tile within a per-generation-safe VMEM budget,
    forced to give >=2 grid steps when possible (v7x dual-TensorCore split)."""
    if B < 8:
        return B                         # full-dim block is always legal
    # Double-buffered VMEM per tile row: x + mask_x blocks (S lanes each) plus the
    # lane-padded pos / tokpos blocks (pad to 128 lanes each); 4 B, x2 buffers.
    bytes_per_row = 2 * 4 * (2 * S + 2 * 128)
    budget = 20 * 1024 * 1024            # fits v7x (64 MiB) as well as v5e/v6e
    tb = min(B, 1024, max(8, budget // bytes_per_row))
    tb -= tb % 8
    tb = max(tb, 8)
    if tb >= B:
        # Split into at least two grid steps so both v7x TensorCores get work.
        half = ((-(-B // 2)) + 7) // 8 * 8
        tb = max(8, min(tb, half))
    return tb


def mask_forward(x, intensity_, sel, *, max_pred,
                 mask_token_id=MASK_TOKEN_ID, donate_x=True):
    """Equivalent of Mask(max_pred).forward(x, intensity_).

    x:          (B, S)    int token ids
    intensity_: (B, 1, S) float intensities (squeezed inside, as in PyTorch)
    sel:        (B, 2)    int ranks in [0, 5): the randperm(5)[:2] draw per row
    returns (mask_x (B,S), mask_token (B,max_pred), mask_pos (B,max_pred)), int32.
    """
    B, S = x.shape
    assert S >= TOPK, "sequence must have at least 5 positions (randperm(5))"
    assert LEN_MASK <= max_pred, "max_pred must be >= 2 (as in the PyTorch module)"

    # Hoisted rank stage (perf review): top-5 by descending intensity, then pick
    # the two randomly chosen ranks.  lax.top_k breaks ties on first index.
    # TODO(synk): sanitize NaN intensities here if they can occur upstream.
    inten = intensity_.reshape(B, S).astype(jnp.float32)       # squeeze(1)
    _, top_idx = lax.top_k(inten, TOPK)                        # (B, 5)
    pos = jnp.take_along_axis(top_idx, sel.astype(jnp.int32), axis=1)
    pos = pos.astype(jnp.int32)                                # (B, 2), distinct per row

    tb = _pick_batch_tile(B, S)
    grid = (pl.cdiv(B, tb),)

    kernel = functools.partial(
        _mask_kernel, mask_token_id=mask_token_id, max_pred=max_pred)

    mask_x, tokpos = pl.pallas_call(
        kernel,
        out_shape=(
            jax.ShapeDtypeStruct((B, S), jnp.int32),
            jax.ShapeDtypeStruct((B, 2 * max_pred), jnp.int32),
        ),
        grid=grid,
        in_specs=[
            pl.BlockSpec((tb, S), lambda i: (i, 0)),
            pl.BlockSpec((tb, 2), lambda i: (i, 0)),
        ],
        out_specs=(
            pl.BlockSpec((tb, S), lambda i: (i, 0)),
            pl.BlockSpec((tb, 2 * max_pred), lambda i: (i, 0)),
        ),
        input_output_aliases=({0: 0} if donate_x else {}),
        compiler_params=pltpu.CompilerParams(
            dimension_semantics=("parallel",),
            vmem_limit_bytes=32 * 1024 * 1024),
    )(x.astype(jnp.int32), pos)

    mask_token = tokpos[:, :max_pred]
    mask_pos = tokpos[:, max_pred:]
    return mask_x, mask_token, mask_pos


def _random_sel(key, batch):
    """torch.randperm(5)[:2] per batch row, drawn with jax.random."""
    keys = jax.random.split(key, batch)
    perm = jax.vmap(lambda k: jax.random.permutation(k, TOPK))(keys)  # (B, 5)
    return perm[:, :LEN_MASK].astype(jnp.int32)


def _reference(x, intensity_, sel, max_pred, mask_token_id=MASK_TOKEN_ID):
    """Pure-JAX replica of the PyTorch forward (given the same random ranks)."""
    B, S = x.shape
    inten = intensity_.reshape(B, S).astype(jnp.float32)
    _, top_idx = jax.lax.top_k(inten, TOPK)                    # (B, 5)
    pos = jnp.take_along_axis(top_idx, sel, axis=1)            # (B, 2)
    col = jnp.arange(S, dtype=jnp.int32)[None, :]
    mask_bool = (col == pos[:, 0:1]) | (col == pos[:, 1:2])
    mask_x = jnp.where(mask_bool, mask_token_id, x).astype(jnp.int32)
    tok = jnp.take_along_axis(x, pos, axis=1).astype(jnp.int32)
    pad = jnp.zeros((B, max_pred - LEN_MASK), jnp.int32)
    mask_token = jnp.concatenate([tok, pad], axis=1)
    mask_pos = jnp.concatenate([pos.astype(jnp.int32), pad], axis=1)
    return mask_x, mask_token, mask_pos


if __name__ == "__main__":
    def run_case(case_key, batch, seq, max_pred):
        kx, ki, ks = jax.random.split(case_key, 3)
        x = jax.random.randint(kx, (batch, seq), 5, 1000, dtype=jnp.int32)
        intensity_ = jax.random.normal(ki, (batch, 1, seq), dtype=jnp.float32)
        sel = _random_sel(ks, batch)   # the randperm(5)[:2] draw, one per row

        fwd = jax.jit(functools.partial(mask_forward, max_pred=max_pred))
        mask_x, mask_token, mask_pos = jax.block_until_ready(
            fwd(x, intensity_, sel))

        ref_mx, ref_tok, ref_pos = _reference(x, intensity_, sel, max_pred)
        assert mask_x.shape == (batch, seq)
        assert mask_token.shape == (batch, max_pred)
        assert mask_pos.shape == (batch, max_pred)
        assert bool(jnp.all(mask_x == ref_mx)), "mask_x mismatch vs reference"
        assert bool(jnp.all(mask_token == ref_tok)), "mask_token mismatch vs reference"
        assert bool(jnp.all(mask_pos == ref_pos)), "mask_pos mismatch vs reference"

    key = jax.random.PRNGKey(0)
    k1, k2 = jax.random.split(key)

    # Small case consistent with the module (seq=128 keeps mask_x lane-dense).
    run_case(k1, batch=4, seq=128, max_pred=5)
    # Multi-tile case: exercises the >=2-step grid (v7x TC split) and a partial
    # last batch block.
    run_case(k2, batch=20, seq=128, max_pred=5)

    print("KERNEL_OK")
</pallas_src>

<mosaic_0001>
module attributes {stable_mosaic.version = 11 : i64} {
  func.func @_mask_kernel(%arg0: i32, %arg1: memref<4x128xi32, #tpu.memory_space<vmem>>, %arg2: memref<4x2xi32, #tpu.memory_space<vmem>>, %arg3: memref<4x128xi32, #tpu.memory_space<vmem>>, %arg4: memref<4x10xi32, #tpu.memory_space<vmem>>) attributes {dimension_semantics = [#tpu.dimension_semantics<parallel>], iteration_bounds = array<i64: 1>, scalar_prefetch = 0 : i64, scratch_operands = 0 : i64, tpu.core_type = #tpu.core_type<tc>, window_params = [{transform_indices = @transform_0, window_bounds = array<i64: 4, 128>}, {transform_indices = @transform_1, window_bounds = array<i64: 4, 2>}, {transform_indices = @transform_2, window_bounds = array<i64: 4, 128>}, {transform_indices = @transform_3, window_bounds = array<i64: 4, 10>}]} {
    %c0 = arith.constant 0 : index
    %c0_0 = arith.constant 0 : index
    %0 = vector.load %arg1[%c0, %c0_0] : memref<4x128xi32, #tpu.memory_space<vmem>>, vector<4x128xi32>
    %c0_1 = arith.constant 0 : index
    %c0_2 = arith.constant 0 : index
    %1 = vector.load %arg2[%c0_1, %c0_2] : memref<4x2xi32, #tpu.memory_space<vmem>>, vector<4x2xi32>
    %2 = tpu.iota {dimensions = array<i32: 1>} : vector<4x128xi32>
    %3 = vector.extract_strided_slice %1 {offsets = [0, 0], sizes = [4, 1], strides = [1, 1]} : vector<4x2xi32> to vector<4x1xi32>
    %4 = vector.extract_strided_slice %1 {offsets = [0, 1], sizes = [4, 1], strides = [1, 1]} : vector<4x2xi32> to vector<4x1xi32>
    %5 = vector.broadcast %3 : vector<4x1xi32> to vector<4x128xi32>
    %6 = arith.cmpi eq, %2, %5 : vector<4x128xi32>
    %7 = vector.broadcast %4 : vector<4x1xi32> to vector<4x128xi32>
    %8 = arith.cmpi eq, %2, %7 : vector<4x128xi32>
    %9 = arith.ori %6, %8 : vector<4x128xi1>
    %c3_i32 = arith.constant 3 : i32
    %10 = vector.broadcast %c3_i32 : i32 to vector<4x128xi32>
    %11 = arith.select %9, %10, %0 : vector<4x128xi1>, vector<4x128xi32>
    %c0_3 = arith.constant 0 : index
    %c0_4 = arith.constant 0 : index
    %12 = vector.load %arg3[%c0_3, %c0_4] : memref<4x128xi32, #tpu.memory_space<vmem>>, vector<4x128xi32>
    tpu.vector_store %arg3[%c0_3, %c0_4], %11 {strides = array<i32>} : memref<4x128xi32, #tpu.memory_space<vmem>>, vector<4x128xi32>,
    %c0_i32 = arith.constant 0 : i32
    %13 = vector.broadcast %c0_i32 : i32 to vector<4x128xi32>
    %14 = arith.select %6, %0, %13 : vector<4x128xi1>, vector<4x128xi32>
    %cst = arith.constant dense<0> : vector<4xi32>
    %15 = vector.multi_reduction <add>, %14, %cst [1] : vector<4x128xi32> to vector<4xi32>
    %16 = vector.shape_cast %15 : vector<4xi32> to vector<4x1xi32>
    %c0_i32_5 = arith.constant 0 : i32
    %17 = vector.broadcast %c0_i32_5 : i32 to vector<4x128xi32>
    %18 = arith.select %8, %0, %17 : vector<4x128xi1>, vector<4x128xi32>
    %cst_6 = arith.constant dense<0> : vector<4xi32>
    %19 = vector.multi_reduction <add>, %18, %cst_6 [1] : vector<4x128xi32> to vector<4xi32>
    %20 = vector.shape_cast %19 : vector<4xi32> to vector<4x1xi32>
    %21 = tpu.iota {dimensions = array<i32: 1>} : vector<4x10xi32>
    %c0_i32_7 = arith.constant 0 : i32
    %22 = vector.broadcast %c0_i32_7 : i32 to vector<4x10xi32>
    %23 = arith.cmpi eq, %21, %22 : vector<4x10xi32>
    %c1_i32 = arith.constant 1 : i32
    %24 = vector.broadcast %c1_i32 : i32 to vector<4x10xi32>
    %25 = arith.cmpi eq, %21, %24 : vector<4x10xi32>
    %c5_i32 = arith.constant 5 : i32
    %26 = vector.broadcast %c5_i32 : i32 to vector<4x10xi32>
    %27 = arith.cmpi eq, %21, %26 : vector<4x10xi32>
    %c6_i32 = arith.constant 6 : i32
    %28 = vector.broadcast %c6_i32 : i32 to vector<4x10xi32>
    %29 = arith.cmpi eq, %21, %28 : vector<4x10xi32>
    %c0_i32_8 = arith.constant 0 : i32
    %30 = vector.shape_cast %4 : vector<4x1xi32> to vector<4x1xi32>
    %31 = vector.broadcast %30 : vector<4x1xi32> to vector<4x10xi32>
    %32 = vector.broadcast %c0_i32_8 : i32 to vector<4x10xi32>
    %33 = arith.select %29, %31, %32 : vector<4x10xi1>, vector<4x10xi32>
    %34 = vector.shape_cast %3 : vector<4x1xi32> to vector<4x1xi32>
    %35 = vector.broadcast %34 : vector<4x1xi32> to vector<4x10xi32>
    %36 = arith.select %27, %35, %33 : vector<4x10xi1>, vector<4x10xi32>
    %37 = vector.shape_cast %20 : vector<4x1xi32> to vector<4x1xi32>
    %38 = vector.broadcast %37 : vector<4x1xi32> to vector<4x10xi32>
    %39 = arith.select %25, %38, %36 : vector<4x10xi1>, vector<4x10xi32>
    %40 = vector.shape_cast %16 : vector<4x1xi32> to vector<4x1xi32>
    %41 = vector.broadcast %40 : vector<4x1xi32> to vector<4x10xi32>
    %42 = arith.select %23, %41, %39 : vector<4x10xi1>, vector<4x10xi32>
    %c0_9 = arith.constant 0 : index
    %c0_10 = arith.constant 0 : index
    %43 = vector.load %arg4[%c0_9, %c0_10] : memref<4x10xi32, #tpu.memory_space<vmem>>, vector<4x10xi32>
    tpu.vector_store %arg4[%c0_9, %c0_10], %42 {strides = array<i32>} : memref<4x10xi32, #tpu.memory_space<vmem>>, vector<4x10xi32>,
    return
  }
  func.func @transform_0(%arg0: i32) -> (i32, i32) {
    %c0_i32 = arith.constant 0 : i32
    %c0_i32_0 = arith.constant 0 : i32
    return %arg0, %c0_i32 : i32, i32
  }
  func.func @transform_1(%arg0: i32) -> (i32, i32) {
    %c0_i32 = arith.constant 0 : i32
    %c0_i32_0 = arith.constant 0 : i32
    return %arg0, %c0_i32 : i32, i32
  }
  func.func @transform_2(%arg0: i32) -> (i32, i32) {
    %c0_i32 = arith.constant 0 : i32
    %c0_i32_0 = arith.constant 0 : i32
    return %arg0, %c0_i32 : i32, i32
  }
  func.func @transform_3(%arg0: i32) -> (i32, i32) {
    %c0_i32 = arith.constant 0 : i32
    %c0_i32_0 = arith.constant 0 : i32
    return %arg0, %c0_i32 : i32, i32
  }
}

</mosaic_0001>

<bundles_post_ra>
// kernel: mask_forward.1
= control target key start
LH: loop header
LB: loop body
LE: loop exit
PB: predicated region body
PF: predicated region fallthrough
CT: control target
= control target key end

     0   :  { %v80_v0 = vmov 1   ;;  %v81_v2 = vmov 0   ;;  %v15_v3 = vlaneseq  ;;  %vm29_vm0 = vcmask 1043456   ;;  %s114_s1 = inlined_call_operand.vmem [shape: s32[4,2], index: 1, kind: input, shape index: {}]   ;;  %s115_s0 = inlined_call_operand.vmem [shape: s32[4,128], index: 0, kind: input, shape index: {}, may-alias: {0,2}]   ;;  %s116_s2 = inlined_call_operand.vmem [shape: s32[4,128], index: 2, kind: output, shape index: {0}, may-alias: {0,2}]   ;;  %s117_s3 = inlined_call_operand.vmem [shape: s32[4,10], index: 3, kind: output, shape index: {1}]  }
   0x1   :  { %77 = vset.pattern.permute.xlu0 %v80_v0  ;;  %v14_v1 = vld [vmem:[%s114_s1] sm:$0xf]  ;;  %vm65_vm8 = vcmask 76800  }
   0x2   :  { %22 = vperm.xlu0 %77, %v14_v1   ;;  %v16_v4 = vand.u32 127, %v15_v3  ;;  %v13_v5 = vld [vmem:[%s115_s0] sm:$0xf] }
   0x4   :  { %vm60_vm4 = vcmp.eq.s32.totalorder %v16_v4, 6  ;;  %vm59_vm5 = vcmp.eq.s32.totalorder %v16_v4, 5  ;;  %vm58_vm6 = vcmp.eq.s32.totalorder %v16_v4, 1  ;;  %vm57_vm7 = vcmp.eq.s32.totalorder %v16_v4, 0 }
   0x6   :  { %78 = vset.pattern.permute.xlu0 %v81_v2 }
   0x7   :  { %18 = vperm.xlu0 %78, %v14_v1  }
   0xb   :  { %79 = vset.pattern.permute.xlu0 %v80_v0 }
  0x7d   :  { %v23_v6 = vpop.permute.xlu0 %22 }
  0x7e   :  { %vm24_vm1 = vcmp.eq.s32.totalorder %v16_v4, %v23_v6  ;;  %v61_v31 = vsel %vm60_vm4, %v23_v6, 0 }
  0x7f   :  { %v43_v7 = vsel %vm24_vm1, %v13_v5, 0 }
  0x80   :  { %v44_v8 = vsel %vm29_vm0, %v43_v7, 0 }
  0x81   :  { %v46_v9 = vshrl.u32 %v44_v8, 16  ;;  %v45_v19 = vand.u32 65535, %v44_v8 }
  0x82   :  { %v19_v10 = vpop.permute.xlu0 %18 }
  0x83   :  { %vm20_vm2 = vcmp.eq.s32.totalorder %v16_v4, %v19_v10  ;;  %v48_v11 = vcvt.s32.f32 %v46_v9  ;;  %v47_v20 = vcvt.s32.f32 %v45_v19  ;;  %v62_v33 = vsel %vm59_vm5, %v19_v10, %v61_v31 }
  0x84   :  { %vm25_vm3 = vmor %vm20_vm2, %vm24_vm1  ;;  %v28_v12 = vsel %vm20_vm2, %v13_v5, 0 }
  0x85   :  { %v26_v13 = vsel %vm25_vm3, 3, %v13_v5  ;;  %51 = vadd.xlane.f32.xlu1 %v48_v11  ;;  %v30_v14 = vsel %vm29_vm0, %v28_v12, 0 }
  0x86   :  { %27 = vst [vmem:[%s116_s2] sm:$0xf] %v26_v13  ;;  %v32_v15 = vshrl.u32 %v30_v14, 16  ;;  %v31_v16 = vand.u32 65535, %v30_v14 }
  0x88   :  { %v34_v17 = vcvt.s32.f32 %v32_v15  ;;  %v33_v18 = vcvt.s32.f32 %v31_v16 }
  0x8a   :  { %37 = vadd.xlane.f32.xlu1 %v34_v17  ;;  %35 = vadd.xlane.f32.xlu0 %v33_v18 }
  0x8e   :  { %49 = vadd.xlane.f32.xlu1 %v47_v20 }
 0x10e   :  { %v52_v21 = vpop.xlane.xlu1 %51 }
 0x10f   :  { %v54_v23 = vcvt.f32.s32 %v52_v21 }
 0x111   :  { %v55_v28 = vshll.u32 %v54_v23, 16 }
 0x113   :  { %v38_v22 = vpop.xlane.xlu1 %37  ;;  %v36_v25 = vpop.xlane.xlu0 %35 }
 0x114   :  { %v40_v24 = vcvt.f32.s32 %v38_v22  ;;  %v39_v30 = vcvt.f32.s32 %v36_v25 }
 0x116   :  { %v41_v26 = vshll.u32 %v40_v24, 16 }
 0x117   :  { %v50_v27 = vpop.xlane.xlu1 %49 }
 0x118   :  { %v53_v29 = vcvt.f32.s32 %v50_v27  ;;  %v42_v34 = vadd.s32 %v41_v26, %v39_v30 }
 0x11a   :  { %v56_v32 = vadd.s32 %v55_v28, %v53_v29 }
 0x11c   :  { %v63_v35 = vsel %vm58_vm6, %v56_v32, %v62_v33 }
 0x11d   :  { %v64_v36 = vsel %vm57_vm7, %v42_v34, %v63_v35 }
 0x11e   :  { %66 = vst.msk [vmem:[%s117_s3] sm:$0xf] %vm65_vm8, %v64_v36 }

</bundles_post_ra>
